<compile_context>
chip_gen: v5e
topology: v5e:2x2
jax: 0.10.0
libtpu: 0.0.40
codegen_flags: <defaults>
</compile_context>

<pallas_src>
import functools
import math

import numpy as np
import jax
import jax.numpy as jnp
from jax.experimental import pallas as pl
from jax.experimental.pallas import tpu as pltpu


# ----------------------------- operator construction (host, cached) -----------------------------

def _smooth_matrix(n: int) -> np.ndarray:
    """1D [1,2,1]/4 blur with replication padding as an (n, n) matrix."""
    s = np.zeros((n, n), dtype=np.float64)
    for i in range(n):
        for dj, wgt in ((-1, 0.25), (0, 0.5), (1, 0.25)):
            j = min(max(i + dj, 0), n - 1)
            s[i, j] += wgt
    return s


def _bilinear_matrix(n_in: int, n_out: int) -> np.ndarray:
    """1D bilinear resize (align_corners=False, PyTorch convention) as (n_out, n_in)."""
    p = np.zeros((n_out, n_in), dtype=np.float64)
    scale = n_in / n_out
    for i in range(n_out):
        src = max((i + 0.5) * scale - 0.5, 0.0)
        j0 = min(int(np.floor(src)), n_in - 1)
        j1 = min(j0 + 1, n_in - 1)
        frac = src - j0
        p[i, j0] += 1.0 - frac
        p[i, j1] += frac
    return p


@functools.lru_cache(maxsize=None)
def _build_operators(h: int, w: int, smooth: bool):
    """M_h (2h, h) and M_w (2w, w): (bilinear 2x up) @ (smooth blur). Cached per shape."""
    s_h = _smooth_matrix(h) if smooth else np.eye(h, dtype=np.float64)
    s_w = _smooth_matrix(w) if smooth else np.eye(w, dtype=np.float64)
    m_h = _bilinear_matrix(h, 2 * h) @ s_h
    m_w = _bilinear_matrix(w, 2 * w) @ s_w
    return m_h.astype(np.float32), m_w.astype(np.float32)


@functools.lru_cache(maxsize=None)
def _device_operators(h: int, w: int, smooth: bool, mat_dtype: str):
    """Transposed operators, cast to the MXU dtype, uploaded once per (h, w, smooth, dtype)."""
    m_h, m_w = _build_operators(h, w, smooth)
    dt = jnp.dtype(mat_dtype)
    mh_t = jax.device_put(jnp.asarray(m_h.T, dtype=dt))   # (h, 2h)
    mw_t = jax.device_put(jnp.asarray(m_w.T, dtype=dt))   # (w, 2w)
    return mh_t, mw_t


# ------------------------------------ VMEM / tiling helpers -------------------------------------

def _vmem_caps() -> tuple[int, int]:
    """(tile working-set budget, vmem_limit_bytes) derived from the chip's VMEM capacity."""
    try:
        cap = int(pltpu.get_tpu_info().vmem_capacity_bytes)   # 128 MiB v5e/v6e, 64 MiB/TC v7x
    except Exception:
        cap = 64 * 1024 * 1024                                # v7x-safe fallback
    limit = int(cap * 0.85)    # headroom for compiler scratch / relayout copies
    budget = int(cap * 0.55)   # target working set (input/output blocks are double-buffered)
    return budget, limit


def _padded_bytes(rows: int, cols: int, itemsize: int) -> int:
    """VMEM footprint of a (rows, cols) tile after sublane (8/16/32) and lane (128) padding."""
    sub = 8 if itemsize >= 4 else 32 // itemsize   # 8 f32, 16 bf16, 32 int8
    pr = -(-rows // sub) * sub
    pc = -(-cols // 128) * 128
    return pr * pc * itemsize


def _tile_vmem_bytes(tile_n: int, h: int, w: int, in_isz: int, out_isz: int, cd_isz: int) -> int:
    """Conservative padded working-set estimate for one grid step."""
    hh, ww = 2 * h, 2 * w
    b = 0
    b += 2 * _padded_bytes(tile_n * h, w, in_isz)        # input block (double-buffered)
    b += 2 * _padded_bytes(tile_n * hh, ww, out_isz)     # output block (double-buffered)
    b += 2 * (_padded_bytes(h, hh, cd_isz) + _padded_bytes(w, ww, cd_isz))   # operators
    # in-kernel intermediates (cast input, two transposed copies, two f32 matmul results)
    b += _padded_bytes(tile_n * h, w, cd_isz)
    b += _padded_bytes(tile_n * w, h, cd_isz)
    b += _padded_bytes(tile_n * w, hh, 4)
    b += _padded_bytes(tile_n * w, hh, cd_isz)
    b += _padded_bytes(tile_n * hh, w, cd_isz)
    b += _padded_bytes(tile_n * hh, ww, 4)
    return b


def _choose_tile_n(n: int, h: int, w: int, in_isz: int, out_isz: int, cd_isz: int,
                   budget: int) -> int:
    """Largest tile_n whose padded working set fits the budget (binary search, monotone)."""
    lo, hi = 1, max(1, n)
    while lo < hi:
        mid = (lo + hi + 1) // 2
        if _tile_vmem_bytes(mid, h, w, in_isz, out_isz, cd_isz) <= budget:
            lo = mid
        else:
            hi = mid - 1
    return lo


# ----------------------------------- Pallas kernel (hot path) -----------------------------------

_HAS_EINSHAPE = hasattr(pltpu, "einshape")


def _swap_minor(x3d):
    """(n, a, b) -> (n, b, a) minor-dim swap; lane-layout-aware einshape when available."""
    if _HAS_EINSHAPE:
        return pltpu.einshape("nab->nba", x3d)
    return jnp.swapaxes(x3d, 1, 2)


def _upsample_kernel(x_ref, mh_t_ref, mw_t_ref, o_ref):
    # x_ref:    (TILE_N*H, W)    input planes, flattened over (n, h)
    # mh_t_ref: (H, 2H)          combined H operator, transposed (matmul dtype)
    # mw_t_ref: (W, 2W)          combined W operator, transposed (matmul dtype)
    # o_ref:    (TILE_N*2H, 2W)  output planes, flattened over (n, 2h) -> plain 2D store
    h, hh = mh_t_ref.shape
    w = mw_t_ref.shape[0]
    tile_n = o_ref.shape[0] // hh
    cdt = mh_t_ref.dtype

    x = x_ref[...].astype(cdt)                                              # (tn*H, W)

    # (1) H contraction FIRST: relayout the *input* (smallest tensor) so H is the
    #     contraction dim — one XLU minor-dim swap, in the matmul dtype.
    xt = _swap_minor(x.reshape(tile_n, h, w)).reshape(tile_n * w, h)        # (tn*W, H)
    y = jnp.dot(xt, mh_t_ref[...], preferred_element_type=jnp.float32)      # (tn*W, 2H) f32 acc
    y = y.astype(cdt)                                                       # bf16 feed for MXU #2

    # (2) One relayout of the small intermediate so the W contraction lands *directly*
    #     in the output layout; the store below needs no transpose/reshape in front of it.
    yt = _swap_minor(y.reshape(tile_n, w, hh)).reshape(tile_n * hh, w)      # (tn*2H, W)
    out = jnp.dot(yt, mw_t_ref[...], preferred_element_type=jnp.float32)    # (tn*2H, 2W) f32 acc
    o_ref[...] = out.astype(o_ref.dtype)


# ---------------------------------------------- wrapper -----------------------------------------

def upsample(x: jax.Array, smooth: bool = True, tile_n: int | None = None,
             use_bf16: bool | None = None) -> jax.Array:
    """Equivalent of Upsample(smooth).forward(x) for NCHW input x -> (B, C, 2H, 2W)."""
    b, c, h, w = x.shape
    hh, ww = 2 * h, 2 * w
    n = b * c

    if use_bf16 is None:
        use_bf16 = (x.dtype == jnp.bfloat16)
    mat_dtype = jnp.bfloat16 if use_bf16 else jnp.float32
    mh_t, mw_t = _device_operators(h, w, bool(smooth), jnp.dtype(mat_dtype).name)

    in_isz = jnp.dtype(x.dtype).itemsize
    out_isz = in_isz
    cd_isz = jnp.dtype(mat_dtype).itemsize
    budget, vmem_limit = _vmem_caps()

    if tile_n is None:
        tile_n = _choose_tile_n(n, h, w, in_isz, out_isz, cd_isz, budget)
        # Keep >= 2 (even) grid steps so "parallel" shards across both v7x TensorCores;
        # on 1-TC chips (v5e/v6e) the extra grid step costs ~0.35 us — negligible.
        if n > 1:
            steps = max(2, pl.cdiv(n, tile_n))
            if steps % 2:
                steps += 1
            steps = min(steps, n)
            tile_n = pl.cdiv(n, steps)
    tile_n = max(1, min(int(tile_n), n))

    # Sublane alignment: (tile_n*h) should be a multiple of the packed sublane tile
    # (8 for f32, 16 for bf16) unless the block covers the full plane extent.
    pack = 8 if in_isz >= 4 else 32 // in_isz
    step = pack // math.gcd(h, pack)
    if tile_n < n:
        tile_n = max(step, (tile_n // step) * step)
        if tile_n > n:
            tile_n = n   # cannot align within n planes -> full extent (always legal)

    grid = (pl.cdiv(n, tile_n),)

    flops = 2 * (n * w) * h * hh + 2 * (n * hh) * w * ww
    bytes_accessed = n * h * w * in_isz + n * hh * ww * out_isz + (h * hh + w * ww) * cd_isz

    out_flat = pl.pallas_call(
        _upsample_kernel,
        out_shape=jax.ShapeDtypeStruct((n * hh, ww), x.dtype),
        grid=grid,
        in_specs=[
            pl.BlockSpec((tile_n * h, w), lambda i: (i, 0)),   # tiled over planes
            pl.BlockSpec((h, hh), lambda i: (0, 0)),           # VMEM-resident operator
            pl.BlockSpec((w, ww), lambda i: (0, 0)),           # VMEM-resident operator
        ],
        out_specs=pl.BlockSpec((tile_n * hh, ww), lambda i: (i, 0)),
        compiler_params=pltpu.CompilerParams(
            dimension_semantics=("parallel",),                 # megacore sharding on v7x
            vmem_limit_bytes=vmem_limit,                       # ~85% of physical VMEM
        ),
        cost_estimate=pl.CostEstimate(
            flops=flops, transcendentals=0, bytes_accessed=bytes_accessed),
    )(x.reshape(n * h, w), mh_t, mw_t)

    return out_flat.reshape(b, c, hh, ww)


# ------------------------------------------------ main ------------------------------------------

if __name__ == "__main__":
    key = jax.random.PRNGKey(0)
    b, c, h, w = 2, 4, 16, 16
    x = jax.random.normal(key, (b, c, h, w), dtype=jnp.float32)

    # auto tiling: at this size the chooser yields grid=(2,) so the pipelined path is exercised
    y = upsample(x, smooth=True)
    jax.block_until_ready(y)
    assert y.shape == (b, c, 2 * h, 2 * w), y.shape
    assert y.dtype == x.dtype

    m_h, m_w = _build_operators(h, w, True)
    ref = np.einsum("ih,bchw,jw->bcij", m_h.astype(np.float64),
                    np.asarray(x, dtype=np.float64), m_w.astype(np.float64))
    np.testing.assert_allclose(np.asarray(y, dtype=np.float64), ref, rtol=5e-3, atol=5e-3)

    # partial final grid block (n % tile_n != 0) — relies on Pallas OOB padding, planes independent
    x2 = jax.random.normal(jax.random.PRNGKey(0), (2, 3, h, w), dtype=jnp.float32)
    y2 = upsample(x2, smooth=True, tile_n=4)
    jax.block_until_ready(y2)
    ref2 = np.einsum("ih,bchw,jw->bcij", m_h.astype(np.float64),
                     np.asarray(x2, dtype=np.float64), m_w.astype(np.float64))
    np.testing.assert_allclose(np.asarray(y2, dtype=np.float64), ref2, rtol=5e-3, atol=5e-3)

    # bf16 fast path: both MXU matmuls on bf16 operands with f32 accumulation
    xb = x.astype(jnp.bfloat16)
    yb = upsample(xb, smooth=True)
    jax.block_until_ready(yb)
    assert yb.dtype == jnp.bfloat16
    refb = np.einsum("ih,bchw,jw->bcij", m_h.astype(np.float64),
                     np.asarray(xb.astype(jnp.float32), dtype=np.float64),
                     m_w.astype(np.float64))
    np.testing.assert_allclose(np.asarray(yb.astype(jnp.float32), dtype=np.float64), refb,
                               rtol=5e-2, atol=1e-1)

    print("KERNEL_OK")
</pallas_src>

<mosaic_0001>
module attributes {stable_mosaic.version = 11 : i64} {
  func.func @_upsample_kernel(%arg0: i32, %arg1: memref<64x16xf32, #tpu.memory_space<vmem>>, %arg2: memref<16x32xf32, #tpu.memory_space<vmem>>, %arg3: memref<16x32xf32, #tpu.memory_space<vmem>>, %arg4: memref<128x32xf32, #tpu.memory_space<vmem>>) attributes {dimension_semantics = [#tpu.dimension_semantics<parallel>], iteration_bounds = array<i64: 2>, scalar_prefetch = 0 : i64, scratch_operands = 0 : i64, tpu.core_type = #tpu.core_type<tc>, window_params = [{transform_indices = @transform_0, window_bounds = array<i64: 64, 16>}, {pipeline_mode = #tpu.pipeline_mode<synchronous>, transform_indices = @transform_1, window_bounds = array<i64: 16, 32>}, {pipeline_mode = #tpu.pipeline_mode<synchronous>, transform_indices = @transform_2, window_bounds = array<i64: 16, 32>}, {transform_indices = @transform_3, window_bounds = array<i64: 128, 32>}]} {
    %c0 = arith.constant 0 : index
    %c0_0 = arith.constant 0 : index
    %0 = vector.load %arg1[%c0, %c0_0] : memref<64x16xf32, #tpu.memory_space<vmem>>, vector<64x16xf32>
    %1 = vector.shape_cast %0 : vector<64x16xf32> to vector<4x16x16xf32>
    %2 = tpu.transpose %1, [0, 2, 1] : vector<4x16x16xf32> -> vector<4x16x16xf32>
    %3 = vector.shape_cast %2 : vector<4x16x16xf32> to vector<64x16xf32>
    %c0_1 = arith.constant 0 : index
    %c0_2 = arith.constant 0 : index
    %4 = vector.load %arg2[%c0_1, %c0_2] : memref<16x32xf32, #tpu.memory_space<vmem>>, vector<16x32xf32>
    %cst = arith.constant dense<0.000000e+00> : vector<64x32xf32>
    %5 = tpu.matmul %3, %4, %cst {dimension_numbers = #tpu.dot_dimension_numbers<[1], [0], [0], [1], [0, 0, 1, 1], [], []>} : vector<64x16xf32>, vector<16x32xf32>, vector<64x32xf32> -> vector<64x32xf32>
    %6 = vector.shape_cast %5 : vector<64x32xf32> to vector<4x16x32xf32>
    %7 = tpu.transpose %6, [0, 2, 1] : vector<4x16x32xf32> -> vector<4x32x16xf32>
    %8 = vector.shape_cast %7 : vector<4x32x16xf32> to vector<128x16xf32>
    %c0_3 = arith.constant 0 : index
    %c0_4 = arith.constant 0 : index
    %9 = vector.load %arg3[%c0_3, %c0_4] : memref<16x32xf32, #tpu.memory_space<vmem>>, vector<16x32xf32>
    %cst_5 = arith.constant dense<0.000000e+00> : vector<128x32xf32>
    %10 = tpu.matmul %8, %9, %cst_5 {dimension_numbers = #tpu.dot_dimension_numbers<[1], [0], [0], [1], [0, 0, 1, 1], [], []>} : vector<128x16xf32>, vector<16x32xf32>, vector<128x32xf32> -> vector<128x32xf32>
    %c0_6 = arith.constant 0 : index
    %c0_7 = arith.constant 0 : index
    %11 = vector.load %arg4[%c0_6, %c0_7] : memref<128x32xf32, #tpu.memory_space<vmem>>, vector<128x32xf32>
    tpu.vector_store %arg4[%c0_6, %c0_7], %10 {strides = array<i32>} : memref<128x32xf32, #tpu.memory_space<vmem>>, vector<128x32xf32>,
    return
  }
  func.func @transform_0(%arg0: i32) -> (i32, i32) {
    %c0_i32 = arith.constant 0 : i32
    %c0_i32_0 = arith.constant 0 : i32
    return %arg0, %c0_i32 : i32, i32
  }
  func.func @transform_1(%arg0: i32) -> (i32, i32) {
    %c0_i32 = arith.constant 0 : i32
    %c0_i32_0 = arith.constant 0 : i32
    %c0_i32_1 = arith.constant 0 : i32
    return %c0_i32, %c0_i32_0 : i32, i32
  }
  func.func @transform_2(%arg0: i32) -> (i32, i32) {
    %c0_i32 = arith.constant 0 : i32
    %c0_i32_0 = arith.constant 0 : i32
    %c0_i32_1 = arith.constant 0 : i32
    return %c0_i32, %c0_i32_0 : i32, i32
  }
  func.func @transform_3(%arg0: i32) -> (i32, i32) {
    %c0_i32 = arith.constant 0 : i32
    %c0_i32_0 = arith.constant 0 : i32
    return %arg0, %c0_i32 : i32, i32
  }
}

</mosaic_0001>

<bundles_post_ra>
// kernel: tpu_custom_call.1
= control target key start
LH: loop header
LB: loop body
LE: loop exit
PB: predicated region body
PF: predicated region fallthrough
CT: control target
= control target key end

     0   :  { %s772_s12 = smov 0   ;;  %s863_s0 = inlined_call_operand.vmem [shape: f32[128,16], index: 0, kind: input, shape index: {}]   ;;  %s864_s1 = inlined_call_operand.vmem [shape: f32[16,32], index: 1, kind: input, shape index: {}]   ;;  %s865_s2 = inlined_call_operand.vmem [shape: f32[16,32], index: 2, kind: input, shape index: {}]   ;;  %s866_s3 = inlined_call_operand.vmem [shape: f32[256,32], index: 3, kind: output, shape index: {}]  }
   0x1 LB: > { %s694_s13 = sadd.s32 4294967295, %s750_s12   ;;  %p698_p0 = scmp.ge.s32.totalorder %s750_s12, 1  ;;  %s750_s12 = sphi %s772_s12, %s13_s12  }
   0x2   : > { %p138_p1 = scmp.lt.s32.totalorder %s750_s12, 3 }
   0x4   : > { %p139_p2 = pnand %p698_p0, %p138_p1 }
   0x5   : > { %s699_s14 = sshll.u32 (!%p139_p2), %s694_s13, 3  ;;  %s701_s27 = sshll.u32 (!%p139_p2), %s694_s13, 4 }
   0x6   : > { %142 = sbr.rel (%p139_p2) target bundleno = 677 (0x2a5), region = 32  ;;  %p163_p3 = scmp.lt.s32.totalorder (!%p139_p2), %s699_s14, 15 }
   0x7   : > { %p169_p4 = scmp.lt.s32.totalorder (!%p139_p2), %s701_s27, 31 }
   0xb   : > { %v311_v0 = vld [vmem:[%s864_s1 + $0x8] sm:$0xff]  ;;  %v310_v1 = vld [vmem:[%s864_s1] sm:$0xff]  ;;  %s868_s14 = smov (!%p163_p3, %s699_s14), 15  ;;  %vm312_vm0 = vcmask 130048   ;;  %s870_s27 = smov (!%p169_p4, %s701_s27), 31  ;;  %vm621_vm1 = vcmask 261120  }
   0xc   : > { %351 = vmatpush.msra.mxu0 %v311_v0  ;;  %729 = vmatpush.msra.mxu3 %v311_v0  ;;  %s700_s19 = sshll.u32 %s868_s14, 3  ;;  %v507_v22 = vld [vmem:[%s865_s2 + $0x8] sm:$0xff]  ;;  %v506_v23 = vld [vmem:[%s865_s2] sm:$0xff]  ;;  %s702_s28 = sshll.u32 %s870_s27, 3 }
   0xd   : > { %s166_s22 = scalar_lea.vmem %s863_s0, %s700_s19  ;;  %570 = vmatpush.msra.mxu1 %v507_v22  ;;  %731 = vmatpush.msra.mxu2 %v507_v22  ;;  %s826_s4 = scalar_lea.vmem %s866_s3, %s702_s28 }
   0xe   : > { %352 = vmatpush.msra.mxu0 %v310_v1  ;;  %730 = vmatpush.msra.mxu3 %v310_v1  ;;  %v174_v2 = vld [vmem:[%s166_s22] sm:$0xff]  ;;  %v176_v3 = vld [vmem:[%s166_s22 + $0x10] sm:$0xff]  ;;  %v175_v5 = vld [vmem:[%s166_s22 + $0x8] sm:$0xff] }
   0xf   : > { %182 = vxpose.xlu0.b32.start [1/2] (short) (narrow) %v174_v2, 16  ;;  %214 = vxpose.xlu1.b32.start [1/2] (short) (narrow) %v176_v3, 16  ;;  %v180_v4 = vld [vmem:[%s166_s22 + $0x30] sm:$0xff]  ;;  %v177_v6 = vld [vmem:[%s166_s22 + $0x18] sm:$0xff]  ;;  %v178_v8 = vld [vmem:[%s166_s22 + $0x20] sm:$0xff] }
  0x10   : > { %278 = vxpose.xlu2.b32.start [1/2] (short) (narrow) %v180_v4, 16  ;;  %v181_v7 = vld [vmem:[%s166_s22 + $0x38] sm:$0xff]  ;;  %v179_v9 = vld [vmem:[%s166_s22 + $0x28] sm:$0xff]  ;;  %732 = vmatpush.msrb.mxu3 %v507_v22 }
  0x11   : > { %571 = vmatpush.msra.mxu1 %v506_v23  ;;  %733 = vmatpush.msra.mxu2 %v506_v23 }
  0x12   : > { %734 = vmatpush.msrb.mxu3 %v506_v23 }
  0x17   : > { %183 = vxpose.xlu0.b32.end [2/2] (short) (narrow) %v175_v5, 16  ;;  %215 = vxpose.xlu1.b32.end [2/2] (short) (narrow) %v177_v6, 16 }
  0x18   : > { %279 = vxpose.xlu2.b32.end [2/2] (short) (narrow) %v181_v7, 16 }
  0x1f   : > { %246 = vxpose.xlu0.b32.start [1/2] (short) (narrow) %v178_v8, 16 }
  0x27   : > { %247 = vxpose.xlu0.b32.end [2/2] (short) (narrow) %v179_v9, 16 }
  0xa9   : > { %v294_v10 = vpop.trf.xlu2 }
  0xaa   : > { %709 = vmatmul.msk.f32.vlgmr.msra.gmra.mxu3 %vm312_vm0, %v294_v10 }
  0xb1   : > { %v295_v12 = vpop.trf.xlu2 }
  0xb2   : > { %710 = vmatmul.msk.f32.gmra.mxu3 %vm312_vm0, %v295_v12 }
  0xb3   : > { %v198_v11 = vpop.trf.xlu0  ;;  %v230_v14 = vpop.trf.xlu1 }
  0xb4   : > { %703 = vmatmul.msk.f32.vlgmr.msra.gmra.mxu0 %vm312_vm0, %v198_v11 }
  0xbb   : > { %v199_v13 = vpop.trf.xlu0  ;;  %v231_v15 = vpop.trf.xlu1 }
  0xbc   : > { %704 = vmatmul.msk.f32.gmra.mxu0 %vm312_vm0, %v199_v13 }
  0xc3   : > { %v262_v16 = vpop.trf.xlu0 }
  0xc4   : > { %705 = vmatmul.msk.f32.gmra.mxu0 %vm312_vm0, %v230_v14 }
  0xcb   : > { %v263_v17 = vpop.trf.xlu0 }
  0xcc   : > { %706 = vmatmul.msk.f32.gmra.mxu0 %vm312_vm0, %v231_v15 }
  0xd4   : > { %707 = vmatmul.msk.f32.gmra.mxu0 %vm312_vm0, %v262_v16 }
  0xdc   : > { %708 = vmatmul.msk.f32.gmra.mxu0 %vm312_vm0, %v263_v17 }
 0x12d   : > { %v372_v26 = vpop.f32.mrf.mxu3 }
 0x131   : > { %v354_v18 = vpop.f32.mrf.mxu0 }
 0x132   : > { %378 = vxpose.xlu2.b32.start [1/2] (short) (narrow) %v354_v18, 32 }
 0x135   : > { %v375_v27 = vpop.f32.mrf.mxu3 }
 0x139   : > { %v357_v19 = vpop.f32.mrf.mxu0 }
 0x13a   : > { %379 = vxpose.xlu2.b32.end [2/2] (short) (narrow) %v357_v19, 32 }
 0x141   : > { %v360_v20 = vpop.f32.mrf.mxu0 }
 0x142   : > { %410 = vxpose.xlu1.b32.start [1/2] (short) (narrow) %v360_v20, 32 }
 0x149   : > { %v363_v21 = vpop.f32.mrf.mxu0 }
 0x14a   : > { %411 = vxpose.xlu1.b32.end [2/2] (short) (narrow) %v363_v21, 32 }
 0x151   : > { %v366_v24 = vpop.f32.mrf.mxu0 }
 0x152   : > { %442 = vxpose.xlu0.b32.start [1/2] (short) (narrow) %v366_v24, 32 }
 0x159   : > { %v369_v25 = vpop.f32.mrf.mxu0 }
 0x15a   : > { %443 = vxpose.xlu0.b32.end [2/2] (short) (narrow) %v369_v25, 32 }
 0x162   : > { %474 = vxpose.xlu1.b32.start [1/2] (short) (narrow) %v372_v26, 32 }
 0x16a   : > { %475 = vxpose.xlu1.b32.end [2/2] (short) (narrow) %v375_v27, 32 }
 0x1cb   : > { %v394_v28 = vpop.trf.xlu2 }
 0x1cc   : > { %711 = vmatmul.msk.f32.vlgmr.msra.gmra.mxu1 %vm312_vm0, %v394_v28 }
 0x1d3   : > { %v395_v29 = vpop.trf.xlu2 }
 0x1d4   : > { %712 = vmatmul.msk.f32.gmra.mxu1 %vm312_vm0, %v395_v29 }
 0x1db   : > { %v396_v30 = vpop.trf.xlu2 }
 0x1dc   : > { %713 = vmatmul.msk.f32.gmra.mxu1 %vm312_vm0, %v396_v30 }
 0x1e3   : > { %v397_v31 = vpop.trf.xlu2 }
 0x1e4   : > { %714 = vmatmul.msk.f32.gmra.mxu1 %vm312_vm0, %v397_v31 }
 0x1e6   : > { %v426_v32 = vpop.trf.xlu1 }
 0x1ec   : > { %715 = vmatmul.msk.f32.gmra.mxu1 %vm312_vm0, %v426_v32 }
 0x1ee   : > { %v427_v33 = vpop.trf.xlu1 }
 0x1f4   : > { %716 = vmatmul.msk.f32.gmra.mxu1 %vm312_vm0, %v427_v33 }
 0x1f6   : > { %v428_v34 = vpop.trf.xlu1  ;;  %v458_v36 = vpop.trf.xlu0 }
 0x1f7   : > { %717 = vmatmul.msk.f32.vlgmr.msra.gmra.mxu2 %vm312_vm0, %v428_v34 }
 0x1fe   : > { %v429_v35 = vpop.trf.xlu1  ;;  %v459_v38 = vpop.trf.xlu0 }
 0x1ff   : > { %718 = vmatmul.msk.f32.gmra.mxu2 %vm312_vm0, %v429_v35 }
 0x206   : > { %v490_v37 = vpop.trf.xlu1  ;;  %v460_v40 = vpop.trf.xlu0 }
 0x207   : > { %719 = vmatmul.msk.f32.gmra.mxu2 %vm312_vm0, %v458_v36  ;;  %723 = vmatmul.msk.f32.vlgmr.msrb.gmra.mxu3 %vm312_vm0, %v490_v37 }
 0x20e   : > { %v491_v39 = vpop.trf.xlu1  ;;  %v461_v42 = vpop.trf.xlu0 }
 0x20f   : > { %720 = vmatmul.msk.f32.gmra.mxu2 %vm312_vm0, %v459_v38  ;;  %724 = vmatmul.msk.f32.gmra.mxu3 %vm312_vm0, %v491_v39 }
 0x216   : > { %v492_v41 = vpop.trf.xlu1 }
 0x217   : > { %721 = vmatmul.msk.f32.gmra.mxu2 %vm312_vm0, %v460_v40  ;;  %725 = vmatmul.msk.f32.gmra.mxu3 %vm312_vm0, %v492_v41 }
 0x21e   : > { %v493_v43 = vpop.trf.xlu1 }
 0x21f   : > { %722 = vmatmul.msk.f32.gmra.mxu2 %vm312_vm0, %v461_v42  ;;  %726 = vmatmul.msk.f32.gmra.mxu3 %vm312_vm0, %v493_v43 }
 0x249   : > { %v573_v44 = vpop.f32.mrf.mxu1 }
 0x24a   : > { %622 = vst.msk [vmem:[%s826_s4] sm:$0xff] %vm621_vm1, %v573_v44 }
 0x251   : > { %v576_v45 = vpop.f32.mrf.mxu1 }
 0x252   : > { %623 = vst.msk [vmem:[%s826_s4 + $0x8] sm:$0xff] %vm621_vm1, %v576_v45 }
 0x259   : > { %v579_v46 = vpop.f32.mrf.mxu1 }
 0x25a   : > { %624 = vst.msk [vmem:[%s826_s4 + $0x10] sm:$0xff] %vm621_vm1, %v579_v46 }
 0x261   : > { %v582_v47 = vpop.f32.mrf.mxu1 }
 0x262   : > { %625 = vst.msk [vmem:[%s826_s4 + $0x18] sm:$0xff] %vm621_vm1, %v582_v47 }
 0x269   : > { %v585_v48 = vpop.f32.mrf.mxu1 }
 0x26a   : > { %626 = vst.msk [vmem:[%s826_s4 + $0x20] sm:$0xff] %vm621_vm1, %v585_v48 }
 0x271   : > { %v588_v49 = vpop.f32.mrf.mxu1 }
 0x272   : > { %627 = vst.msk [vmem:[%s826_s4 + $0x28] sm:$0xff] %vm621_vm1, %v588_v49 }
 0x27a   : > { %v591_v50 = vpop.f32.mrf.mxu2 }
 0x27b   : > { %628 = vst.msk [vmem:[%s826_s4 + $0x30] sm:$0xff] %vm621_vm1, %v591_v50 }
 0x282   : > { %v594_v51 = vpop.f32.mrf.mxu2 }
 0x283   : > { %629 = vst.msk [vmem:[%s826_s4 + $0x38] sm:$0xff] %vm621_vm1, %v594_v51 }
 0x28a   : > { %v597_v52 = vpop.f32.mrf.mxu2  ;;  %v609_v53 = vpop.f32.mrf.mxu3 }
 0x28b   : > { %630 = vst.msk [vmem:[%s826_s4 + $0x40] sm:$0xff] %vm621_vm1, %v597_v52 }
 0x28c   : > { %634 = vst.msk [vmem:[%s826_s4 + $0x60] sm:$0xff] %vm621_vm1, %v609_v53 }
 0x292   : > { %v600_v54 = vpop.f32.mrf.mxu2  ;;  %v612_v55 = vpop.f32.mrf.mxu3 }
 0x293   : > { %631 = vst.msk [vmem:[%s826_s4 + $0x48] sm:$0xff] %vm621_vm1, %v600_v54 }
 0x294   : > { %635 = vst.msk [vmem:[%s826_s4 + $0x68] sm:$0xff] %vm621_vm1, %v612_v55 }
 0x29a   : > { %v603_v56 = vpop.f32.mrf.mxu2  ;;  %v615_v57 = vpop.f32.mrf.mxu3 }
 0x29b   : > { %632 = vst.msk [vmem:[%s826_s4 + $0x50] sm:$0xff] %vm621_vm1, %v603_v56 }
 0x29c   : > { %636 = vst.msk [vmem:[%s826_s4 + $0x70] sm:$0xff] %vm621_vm1, %v615_v57 }
 0x2a2   : > { %v606_v58 = vpop.f32.mrf.mxu2  ;;  %v618_v59 = vpop.f32.mrf.mxu3 }
 0x2a3   : > { %633 = vst.msk [vmem:[%s826_s4 + $0x58] sm:$0xff] %vm621_vm1, %v606_v58 }
 0x2a4   : > { %637 = vst.msk [vmem:[%s826_s4 + $0x78] sm:$0xff] %vm621_vm1, %v618_v59 }
 0x2a5 PF: > { %s13_s12 = sadd.s32 1, %s750_s12  }
 0x2a6   : > { %p10_p5 = scmp.ge.s32.totalorder %s13_s12, 4  }
 0x2a8   :  { %12 = sbr.rel (!%p10_p5) target bundleno = 1 (0x1), region = 62 }

</bundles_post_ra>
